<compile_context>
chip_gen: v7x
topology: tpu7x:2x2x1
jax: 0.10.0
libtpu: 0.0.40
codegen_flags: <defaults>
</compile_context>

<pallas_src>
import jax
import jax.numpy as jnp
from jax import lax
from jax.experimental import pallas as pl
from jax.experimental.pallas import tpu as pltpu

LANE = 128


def _round_up(x, m):
    return (x + m - 1) // m * m


def _pick_batch_tile(B, cap=256):
    """Largest 8-aligned tile dividing B while keeping >= 2 grid steps (v7x megacore).

    cap ~ 256 targets v6e/v7x MXU height; use 128 on v5e if tuning per chip.
    """
    if B <= 8 or B % 8 != 0:
        return B                              # single full-batch tile (always legal)
    target = min(cap, max(8, _round_up(B // 2, 8)))
    for tb in range(target, 7, -8):
        if B % tb == 0:
            return tb
    return B


def _anomaly_kernel(ids_ref, mask_ref, emb_ref, w1_ref, b1_ref, w2_ref, b2_ref, out_ref):
    """Fused embedding gather + masked mean pooling + 2-layer MLP for one batch tile.

    ids_ref:  (TB, S)   int32 token ids
    mask_ref: (TB, S)   f32 attention mask
    emb_ref:  (Vp, Dp)  bf16 embedding table (zero-padded to lane multiples)
    w1_ref:   (Dp, Hp)  bf16     b1_ref: (1, Hp) f32
    w2_ref:   (Hp, Cp)  bf16     b2_ref: (1, Cp) f32
    out_ref:  (TB, Cp)  f32 logits (padded class columns are zero; sliced in wrapper)
    """
    ids = ids_ref[...]                                   # (TB, S) int32
    mask = mask_ref[...]                                 # (TB, S) f32
    tb, seq = ids.shape
    vp = emb_ref.shape[0]

    # Gather-as-matmul pooling weights, built with a 2-D accumulator (no (TB,S,Vp) blob):
    #   token_weights[b, v] = sum_s mask[b, s] * [ids[b, s] == v]
    vocab_iota = lax.broadcasted_iota(jnp.int32, (tb, vp), 1)         # (TB, Vp)
    token_weights = jnp.zeros((tb, vp), jnp.float32)
    for s in range(seq):                 # static unroll; S is a compile-time constant
        hit = ids[:, s:s + 1] == vocab_iota                           # (TB, Vp) bool
        token_weights = token_weights + jnp.where(hit, mask[:, s:s + 1], 0.0)

    # pooled_sum[b, :] = token_weights[b, :] @ embed_table  (bf16 operands, f32 MXU acc;
    # counts are small exact integers so the bf16 cast is lossless).
    pooled_sum = jnp.dot(token_weights.astype(jnp.bfloat16), emb_ref[...],
                         preferred_element_type=jnp.float32)          # (TB, Dp) f32

    # mean_pooling denominator: clamp(sum(mask), 1e-9); exact divide (review note).
    counts = jnp.maximum(jnp.sum(mask, axis=1, keepdims=True), 1e-9)  # (TB, 1)
    pooled = pooled_sum / counts                                      # (TB, Dp) f32

    # classifier: Linear -> ReLU -> (Dropout == identity in eval) -> Linear
    h1 = jnp.dot(pooled.astype(jnp.bfloat16), w1_ref[...],
                 preferred_element_type=jnp.float32) + b1_ref[...]
    h1 = jnp.maximum(h1, 0.0)                                         # f32 VPU (v5e-safe)
    logits = jnp.dot(h1.astype(jnp.bfloat16), w2_ref[...],
                     preferred_element_type=jnp.float32) + b2_ref[...]
    out_ref[...] = logits.astype(out_ref.dtype)


def _invariant_spec(shape):
    """BlockSpec for a grid-invariant, VMEM-resident operand (single-buffered)."""
    idx = lambda b: (0, 0)
    try:
        return pl.BlockSpec(shape, idx, pipeline_mode=pl.Buffered(1))
    except (TypeError, AttributeError):
        # older jax without pipeline_mode / Buffered: fall back to default buffering
        return pl.BlockSpec(shape, idx)


def anomaly_detector_forward(input_ids, attention_mask, params, *, batch_tile_cap=256):
    """Full forward: fused embedding lookup + masked mean pooling + classifier."""
    B, S = input_ids.shape
    emb_p, w1_p, b1_p, w2_p, b2_p = (params[k] for k in ("emb_p", "w1_p", "b1_p", "w2_p", "b2_p"))
    Vp, Dp = emb_p.shape
    Hp = w1_p.shape[1]
    Cp = w2_p.shape[1]
    C = params["num_class"]

    TB = _pick_batch_tile(B, batch_tile_cap)
    tile = lambda b: (b, 0)      # batch-tiled arrays

    logits_p = pl.pallas_call(
        _anomaly_kernel,
        out_shape=jax.ShapeDtypeStruct((B, Cp), jnp.float32),
        grid_spec=pltpu.PrefetchScalarGridSpec(
            num_scalar_prefetch=0,
            grid=(B // TB,),
            in_specs=[
                pl.BlockSpec((TB, S), tile),      # input_ids
                pl.BlockSpec((TB, S), tile),      # attention_mask
                _invariant_spec((Vp, Dp)),        # embedding table (VMEM-resident)
                _invariant_spec((Dp, Hp)),        # w1
                _invariant_spec((1, Hp)),         # b1
                _invariant_spec((Hp, Cp)),        # w2
                _invariant_spec((1, Cp)),         # b2
            ],
            out_specs=pl.BlockSpec((TB, Cp), tile),   # lane-dense (Cp multiple of 128)
        ),
        compiler_params=pltpu.CompilerParams(
            # batch tiles are independent -> v7x's two TensorCores split the grid
            dimension_semantics=("parallel",),
            # resident footprint here is ~100 KiB; set vmem_limit_bytes=... only if
            # vocab/D/TB grow past the 16/32 MiB default scoped VMEM limit.
        ),
    )(
        input_ids.astype(jnp.int32),
        attention_mask.astype(jnp.float32),
        emb_p, w1_p, b1_p, w2_p, b2_p,
    )
    return logits_p[:, :C]


def init_params(key, vocab_size=100, embed_dim=32, hidden_dim=128, num_class=2):
    """Initialize weights; lane padding + bf16 casting is done ONCE here (not per call)."""
    k0, k1, k2 = jax.random.split(key, 3)
    embed_table = jax.random.normal(k0, (vocab_size, embed_dim), jnp.float32) * 0.1
    # nn.Linear stores weight (out, in); we keep the transposed [in, out] layout so the
    # kernel computes x @ W (numerically identical to torch's x @ W.T).
    w1 = jax.random.normal(k1, (embed_dim, hidden_dim), jnp.float32) / jnp.sqrt(float(embed_dim))
    b1 = jnp.zeros((hidden_dim,), jnp.float32)
    w2 = jax.random.normal(k2, (hidden_dim, num_class), jnp.float32) / jnp.sqrt(float(hidden_dim))
    b2 = jnp.zeros((num_class,), jnp.float32)

    Vp, Dp, Hp, Cp = (_round_up(x, LANE) for x in (vocab_size, embed_dim, hidden_dim, num_class))
    return {
        # padded, kernel-ready operands (matmul operands bf16, biases f32)
        "emb_p": jnp.zeros((Vp, Dp), jnp.bfloat16)
                    .at[:vocab_size, :embed_dim].set(embed_table.astype(jnp.bfloat16)),
        "w1_p": jnp.zeros((Dp, Hp), jnp.bfloat16)
                    .at[:embed_dim, :hidden_dim].set(w1.astype(jnp.bfloat16)),
        "b1_p": jnp.zeros((1, Hp), jnp.float32).at[0, :hidden_dim].set(b1),
        "w2_p": jnp.zeros((Hp, Cp), jnp.bfloat16)
                    .at[:hidden_dim, :num_class].set(w2.astype(jnp.bfloat16)),
        "b2_p": jnp.zeros((1, Cp), jnp.float32).at[0, :num_class].set(b2),
        "num_class": num_class,
        # unpadded f32 originals (reference checks / export only; unused by the kernel)
        "embed_table": embed_table, "w1": w1, "b1": b1, "w2": w2, "b2": b2,
    }


if __name__ == "__main__":
    key = jax.random.PRNGKey(0)
    B, S = 16, 8
    vocab_size, embed_dim, hidden_dim, num_class = 100, 32, 128, 2

    k_ids, k_len, k_params = jax.random.split(key, 3)
    input_ids = jax.random.randint(k_ids, (B, S), 0, vocab_size, dtype=jnp.int32)
    # variable-length sequences with trailing padding
    lengths = jax.random.randint(k_len, (B,), 1, S + 1)
    attention_mask = (jnp.arange(S)[None, :] < lengths[:, None]).astype(jnp.int32)

    params = init_params(k_params, vocab_size, embed_dim, hidden_dim, num_class)

    logits = anomaly_detector_forward(input_ids, attention_mask, params)
    jax.block_until_ready(logits)
    assert logits.shape == (B, num_class)

    m = attention_mask.astype(jnp.float32)[:, :, None]
    counts = jnp.maximum(m.sum(axis=1), 1e-9)

    # Reference 1: dtype-matched (bf16 matmul operands, f32 accumulation) -- tight check.
    emb_q = params["embed_table"].astype(jnp.bfloat16).astype(jnp.float32)
    w1_q = params["w1"].astype(jnp.bfloat16).astype(jnp.float32)
    w2_q = params["w2"].astype(jnp.bfloat16).astype(jnp.float32)
    pooled_q = jnp.sum(jnp.take(emb_q, input_ids, axis=0) * m, axis=1) / counts
    h1_q = jnp.maximum(pooled_q.astype(jnp.bfloat16).astype(jnp.float32) @ w1_q + params["b1"], 0.0)
    ref_q = h1_q.astype(jnp.bfloat16).astype(jnp.float32) @ w2_q + params["b2"]
    assert jnp.allclose(logits, ref_q, atol=5e-3, rtol=5e-3), float(jnp.max(jnp.abs(logits - ref_q)))

    # Reference 2: pure-f32 PyTorch eval() semantics -- bf16-precision sanity check.
    pooled = jnp.sum(jnp.take(params["embed_table"], input_ids, axis=0) * m, axis=1) / counts
    ref = jnp.maximum(pooled @ params["w1"] + params["b1"], 0.0) @ params["w2"] + params["b2"]
    assert jnp.allclose(logits, ref, atol=3e-2, rtol=3e-2), float(jnp.max(jnp.abs(logits - ref)))

    print("KERNEL_OK")
</pallas_src>

<mosaic_0001>
module attributes {stable_mosaic.version = 11 : i64} {
  func.func @_anomaly_kernel(%arg0: i32, %arg1: memref<8x8xi32, #tpu.memory_space<vmem>>, %arg2: memref<8x8xf32, #tpu.memory_space<vmem>>, %arg3: memref<128x128xbf16, #tpu.memory_space<vmem>>, %arg4: memref<128x128xbf16, #tpu.memory_space<vmem>>, %arg5: memref<1x128xf32, #tpu.memory_space<vmem>>, %arg6: memref<128x128xbf16, #tpu.memory_space<vmem>>, %arg7: memref<1x128xf32, #tpu.memory_space<vmem>>, %arg8: memref<8x128xf32, #tpu.memory_space<vmem>>) attributes {dimension_semantics = [#tpu.dimension_semantics<parallel>], iteration_bounds = array<i64: 2>, scalar_prefetch = 0 : i64, scratch_operands = 0 : i64, tpu.core_type = #tpu.core_type<tc>, window_params = [{transform_indices = @transform_0, window_bounds = array<i64: 8, 8>}, {transform_indices = @transform_1, window_bounds = array<i64: 8, 8>}, {pipeline_mode = #tpu.pipeline_mode<synchronous>, transform_indices = @transform_2, window_bounds = array<i64: 128, 128>}, {pipeline_mode = #tpu.pipeline_mode<synchronous>, transform_indices = @transform_3, window_bounds = array<i64: 128, 128>}, {pipeline_mode = #tpu.pipeline_mode<synchronous>, transform_indices = @transform_4, window_bounds = array<i64: 1, 128>}, {pipeline_mode = #tpu.pipeline_mode<synchronous>, transform_indices = @transform_5, window_bounds = array<i64: 128, 128>}, {pipeline_mode = #tpu.pipeline_mode<synchronous>, transform_indices = @transform_6, window_bounds = array<i64: 1, 128>}, {transform_indices = @transform_7, window_bounds = array<i64: 8, 128>}]} {
    %c0 = arith.constant 0 : index
    %c0_0 = arith.constant 0 : index
    %0 = vector.load %arg1[%c0, %c0_0] : memref<8x8xi32, #tpu.memory_space<vmem>>, vector<8x8xi32>
    %c0_1 = arith.constant 0 : index
    %c0_2 = arith.constant 0 : index
    %1 = vector.load %arg2[%c0_1, %c0_2] : memref<8x8xf32, #tpu.memory_space<vmem>>, vector<8x8xf32>
    %2 = tpu.iota {dimensions = array<i32: 1>} : vector<8x128xi32>
    %cst = arith.constant 0.000000e+00 : f32
    %3 = vector.broadcast %cst : f32 to vector<8x128xf32>
    %4 = vector.extract_strided_slice %0 {offsets = [0, 0], sizes = [8, 1], strides = [1, 1]} : vector<8x8xi32> to vector<8x1xi32>
    %5 = vector.broadcast %4 : vector<8x1xi32> to vector<8x128xi32>
    %6 = arith.cmpi eq, %5, %2 : vector<8x128xi32>
    %7 = vector.extract_strided_slice %1 {offsets = [0, 0], sizes = [8, 1], strides = [1, 1]} : vector<8x8xf32> to vector<8x1xf32>
    %cst_3 = arith.constant 0.000000e+00 : f32
    %8 = vector.shape_cast %7 : vector<8x1xf32> to vector<8x1xf32>
    %9 = vector.broadcast %8 : vector<8x1xf32> to vector<8x128xf32>
    %10 = vector.broadcast %cst_3 : f32 to vector<8x128xf32>
    %11 = arith.select %6, %9, %10 : vector<8x128xi1>, vector<8x128xf32>
    %12 = arith.addf %3, %11 : vector<8x128xf32>
    %13 = vector.extract_strided_slice %0 {offsets = [0, 1], sizes = [8, 1], strides = [1, 1]} : vector<8x8xi32> to vector<8x1xi32>
    %14 = vector.broadcast %13 : vector<8x1xi32> to vector<8x128xi32>
    %15 = arith.cmpi eq, %14, %2 : vector<8x128xi32>
    %16 = vector.extract_strided_slice %1 {offsets = [0, 1], sizes = [8, 1], strides = [1, 1]} : vector<8x8xf32> to vector<8x1xf32>
    %cst_4 = arith.constant 0.000000e+00 : f32
    %17 = vector.shape_cast %16 : vector<8x1xf32> to vector<8x1xf32>
    %18 = vector.broadcast %17 : vector<8x1xf32> to vector<8x128xf32>
    %19 = vector.broadcast %cst_4 : f32 to vector<8x128xf32>
    %20 = arith.select %15, %18, %19 : vector<8x128xi1>, vector<8x128xf32>
    %21 = arith.addf %12, %20 : vector<8x128xf32>
    %22 = vector.extract_strided_slice %0 {offsets = [0, 2], sizes = [8, 1], strides = [1, 1]} : vector<8x8xi32> to vector<8x1xi32>
    %23 = vector.broadcast %22 : vector<8x1xi32> to vector<8x128xi32>
    %24 = arith.cmpi eq, %23, %2 : vector<8x128xi32>
    %25 = vector.extract_strided_slice %1 {offsets = [0, 2], sizes = [8, 1], strides = [1, 1]} : vector<8x8xf32> to vector<8x1xf32>
    %cst_5 = arith.constant 0.000000e+00 : f32
    %26 = vector.shape_cast %25 : vector<8x1xf32> to vector<8x1xf32>
    %27 = vector.broadcast %26 : vector<8x1xf32> to vector<8x128xf32>
    %28 = vector.broadcast %cst_5 : f32 to vector<8x128xf32>
    %29 = arith.select %24, %27, %28 : vector<8x128xi1>, vector<8x128xf32>
    %30 = arith.addf %21, %29 : vector<8x128xf32>
    %31 = vector.extract_strided_slice %0 {offsets = [0, 3], sizes = [8, 1], strides = [1, 1]} : vector<8x8xi32> to vector<8x1xi32>
    %32 = vector.broadcast %31 : vector<8x1xi32> to vector<8x128xi32>
    %33 = arith.cmpi eq, %32, %2 : vector<8x128xi32>
    %34 = vector.extract_strided_slice %1 {offsets = [0, 3], sizes = [8, 1], strides = [1, 1]} : vector<8x8xf32> to vector<8x1xf32>
    %cst_6 = arith.constant 0.000000e+00 : f32
    %35 = vector.shape_cast %34 : vector<8x1xf32> to vector<8x1xf32>
    %36 = vector.broadcast %35 : vector<8x1xf32> to vector<8x128xf32>
    %37 = vector.broadcast %cst_6 : f32 to vector<8x128xf32>
    %38 = arith.select %33, %36, %37 : vector<8x128xi1>, vector<8x128xf32>
    %39 = arith.addf %30, %38 : vector<8x128xf32>
    %40 = vector.extract_strided_slice %0 {offsets = [0, 4], sizes = [8, 1], strides = [1, 1]} : vector<8x8xi32> to vector<8x1xi32>
    %41 = vector.broadcast %40 : vector<8x1xi32> to vector<8x128xi32>
    %42 = arith.cmpi eq, %41, %2 : vector<8x128xi32>
    %43 = vector.extract_strided_slice %1 {offsets = [0, 4], sizes = [8, 1], strides = [1, 1]} : vector<8x8xf32> to vector<8x1xf32>
    %cst_7 = arith.constant 0.000000e+00 : f32
    %44 = vector.shape_cast %43 : vector<8x1xf32> to vector<8x1xf32>
    %45 = vector.broadcast %44 : vector<8x1xf32> to vector<8x128xf32>
    %46 = vector.broadcast %cst_7 : f32 to vector<8x128xf32>
    %47 = arith.select %42, %45, %46 : vector<8x128xi1>, vector<8x128xf32>
    %48 = arith.addf %39, %47 : vector<8x128xf32>
    %49 = vector.extract_strided_slice %0 {offsets = [0, 5], sizes = [8, 1], strides = [1, 1]} : vector<8x8xi32> to vector<8x1xi32>
    %50 = vector.broadcast %49 : vector<8x1xi32> to vector<8x128xi32>
    %51 = arith.cmpi eq, %50, %2 : vector<8x128xi32>
    %52 = vector.extract_strided_slice %1 {offsets = [0, 5], sizes = [8, 1], strides = [1, 1]} : vector<8x8xf32> to vector<8x1xf32>
    %cst_8 = arith.constant 0.000000e+00 : f32
    %53 = vector.shape_cast %52 : vector<8x1xf32> to vector<8x1xf32>
    %54 = vector.broadcast %53 : vector<8x1xf32> to vector<8x128xf32>
    %55 = vector.broadcast %cst_8 : f32 to vector<8x128xf32>
    %56 = arith.select %51, %54, %55 : vector<8x128xi1>, vector<8x128xf32>
    %57 = arith.addf %48, %56 : vector<8x128xf32>
    %58 = vector.extract_strided_slice %0 {offsets = [0, 6], sizes = [8, 1], strides = [1, 1]} : vector<8x8xi32> to vector<8x1xi32>
    %59 = vector.broadcast %58 : vector<8x1xi32> to vector<8x128xi32>
    %60 = arith.cmpi eq, %59, %2 : vector<8x128xi32>
    %61 = vector.extract_strided_slice %1 {offsets = [0, 6], sizes = [8, 1], strides = [1, 1]} : vector<8x8xf32> to vector<8x1xf32>
    %cst_9 = arith.constant 0.000000e+00 : f32
    %62 = vector.shape_cast %61 : vector<8x1xf32> to vector<8x1xf32>
    %63 = vector.broadcast %62 : vector<8x1xf32> to vector<8x128xf32>
    %64 = vector.broadcast %cst_9 : f32 to vector<8x128xf32>
    %65 = arith.select %60, %63, %64 : vector<8x128xi1>, vector<8x128xf32>
    %66 = arith.addf %57, %65 : vector<8x128xf32>
    %67 = vector.extract_strided_slice %0 {offsets = [0, 7], sizes = [8, 1], strides = [1, 1]} : vector<8x8xi32> to vector<8x1xi32>
    %68 = vector.broadcast %67 : vector<8x1xi32> to vector<8x128xi32>
    %69 = arith.cmpi eq, %68, %2 : vector<8x128xi32>
    %70 = vector.extract_strided_slice %1 {offsets = [0, 7], sizes = [8, 1], strides = [1, 1]} : vector<8x8xf32> to vector<8x1xf32>
    %cst_10 = arith.constant 0.000000e+00 : f32
    %71 = vector.shape_cast %70 : vector<8x1xf32> to vector<8x1xf32>
    %72 = vector.broadcast %71 : vector<8x1xf32> to vector<8x128xf32>
    %73 = vector.broadcast %cst_10 : f32 to vector<8x128xf32>
    %74 = arith.select %69, %72, %73 : vector<8x128xi1>, vector<8x128xf32>
    %75 = arith.addf %66, %74 : vector<8x128xf32>
    %76 = arith.truncf %75 : vector<8x128xf32> to vector<8x128xbf16>
    %c0_11 = arith.constant 0 : index
    %c0_12 = arith.constant 0 : index
    %77 = vector.load %arg3[%c0_11, %c0_12] : memref<128x128xbf16, #tpu.memory_space<vmem>>, vector<128x128xbf16>
    %cst_13 = arith.constant dense<0.000000e+00> : vector<8x128xf32>
    %78 = tpu.matmul %76, %77, %cst_13 {dimension_numbers = #tpu.dot_dimension_numbers<[1], [0], [0], [1], [0, 0, 1, 1], [], []>} : vector<8x128xbf16>, vector<128x128xbf16>, vector<8x128xf32> -> vector<8x128xf32>
    %cst_14 = arith.constant dense<0.000000e+00> : vector<8xf32>
    %79 = vector.multi_reduction <add>, %1, %cst_14 [1] : vector<8x8xf32> to vector<8xf32>
    %80 = vector.shape_cast %79 : vector<8xf32> to vector<8x1xf32>
    %cst_15 = arith.constant 9.99999971E-10 : f32
    %81 = vector.broadcast %cst_15 : f32 to vector<8x1xf32>
    %82 = arith.maximumf %80, %81 : vector<8x1xf32>
    %83 = vector.broadcast %82 : vector<8x1xf32> to vector<8x128xf32>
    %84 = arith.divf %78, %83 : vector<8x128xf32>
    %85 = arith.truncf %84 : vector<8x128xf32> to vector<8x128xbf16>
    %c0_16 = arith.constant 0 : index
    %c0_17 = arith.constant 0 : index
    %86 = vector.load %arg4[%c0_16, %c0_17] : memref<128x128xbf16, #tpu.memory_space<vmem>>, vector<128x128xbf16>
    %cst_18 = arith.constant dense<0.000000e+00> : vector<8x128xf32>
    %87 = tpu.matmul %85, %86, %cst_18 {dimension_numbers = #tpu.dot_dimension_numbers<[1], [0], [0], [1], [0, 0, 1, 1], [], []>} : vector<8x128xbf16>, vector<128x128xbf16>, vector<8x128xf32> -> vector<8x128xf32>
    %c0_19 = arith.constant 0 : index
    %c0_20 = arith.constant 0 : index
    %88 = vector.load %arg5[%c0_19, %c0_20] : memref<1x128xf32, #tpu.memory_space<vmem>>, vector<1x128xf32>
    %89 = vector.broadcast %88 : vector<1x128xf32> to vector<8x128xf32>
    %90 = arith.addf %87, %89 : vector<8x128xf32>
    %cst_21 = arith.constant 0.000000e+00 : f32
    %91 = vector.broadcast %cst_21 : f32 to vector<8x128xf32>
    %92 = arith.maximumf %90, %91 : vector<8x128xf32>
    %93 = arith.truncf %92 : vector<8x128xf32> to vector<8x128xbf16>
    %c0_22 = arith.constant 0 : index
    %c0_23 = arith.constant 0 : index
    %94 = vector.load %arg6[%c0_22, %c0_23] : memref<128x128xbf16, #tpu.memory_space<vmem>>, vector<128x128xbf16>
    %cst_24 = arith.constant dense<0.000000e+00> : vector<8x128xf32>
    %95 = tpu.matmul %93, %94, %cst_24 {dimension_numbers = #tpu.dot_dimension_numbers<[1], [0], [0], [1], [0, 0, 1, 1], [], []>} : vector<8x128xbf16>, vector<128x128xbf16>, vector<8x128xf32> -> vector<8x128xf32>
    %c0_25 = arith.constant 0 : index
    %c0_26 = arith.constant 0 : index
    %96 = vector.load %arg7[%c0_25, %c0_26] : memref<1x128xf32, #tpu.memory_space<vmem>>, vector<1x128xf32>
    %97 = vector.broadcast %96 : vector<1x128xf32> to vector<8x128xf32>
    %98 = arith.addf %95, %97 : vector<8x128xf32>
    %c0_27 = arith.constant 0 : index
    %c0_28 = arith.constant 0 : index
    %99 = vector.load %arg8[%c0_27, %c0_28] : memref<8x128xf32, #tpu.memory_space<vmem>>, vector<8x128xf32>
    tpu.vector_store %arg8[%c0_27, %c0_28], %98 {strides = array<i32>} : memref<8x128xf32, #tpu.memory_space<vmem>>, vector<8x128xf32>,
    return
  }
  func.func @transform_0(%arg0: i32) -> (i32, i32) {
    %c0_i32 = arith.constant 0 : i32
    %c0_i32_0 = arith.constant 0 : i32
    return %arg0, %c0_i32 : i32, i32
  }
  func.func @transform_1(%arg0: i32) -> (i32, i32) {
    %c0_i32 = arith.constant 0 : i32
    %c0_i32_0 = arith.constant 0 : i32
    return %arg0, %c0_i32 : i32, i32
  }
  func.func @transform_2(%arg0: i32) -> (i32, i32) {
    %c0_i32 = arith.constant 0 : i32
    %c0_i32_0 = arith.constant 0 : i32
    %c0_i32_1 = arith.constant 0 : i32
    return %c0_i32, %c0_i32_0 : i32, i32
  }
  func.func @transform_3(%arg0: i32) -> (i32, i32) {
    %c0_i32 = arith.constant 0 : i32
    %c0_i32_0 = arith.constant 0 : i32
    %c0_i32_1 = arith.constant 0 : i32
    return %c0_i32, %c0_i32_0 : i32, i32
  }
  func.func @transform_4(%arg0: i32) -> (i32, i32) {
    %c0_i32 = arith.constant 0 : i32
    %c0_i32_0 = arith.constant 0 : i32
    %c0_i32_1 = arith.constant 0 : i32
    return %c0_i32, %c0_i32_0 : i32, i32
  }
  func.func @transform_5(%arg0: i32) -> (i32, i32) {
    %c0_i32 = arith.constant 0 : i32
    %c0_i32_0 = arith.constant 0 : i32
    %c0_i32_1 = arith.constant 0 : i32
    return %c0_i32, %c0_i32_0 : i32, i32
  }
  func.func @transform_6(%arg0: i32) -> (i32, i32) {
    %c0_i32 = arith.constant 0 : i32
    %c0_i32_0 = arith.constant 0 : i32
    %c0_i32_1 = arith.constant 0 : i32
    return %c0_i32, %c0_i32_0 : i32, i32
  }
  func.func @transform_7(%arg0: i32) -> (i32, i32) {
    %c0_i32 = arith.constant 0 : i32
    %c0_i32_0 = arith.constant 0 : i32
    return %arg0, %c0_i32 : i32, i32
  }
}

</mosaic_0001>

<bundles_post_ra>
// kernel: tpu_custom_call.1
= control target key start
LH: loop header
LB: loop body
LE: loop exit
PB: predicated region body
PF: predicated region fallthrough
CT: control target
= control target key end

     0   :  { %12 = vsyncpa [#allocation3], 0  ;;  %s1521_s0 = inlined_call_operand.vmem [shape: s32[16,8], index: 0, kind: input, shape index: {}]   ;;  %s1522_s1 = inlined_call_operand.vmem [shape: f32[16,8], index: 1, kind: input, shape index: {}]   ;;  %s1523_s2 = inlined_call_operand.hbm [shape: bf16[128,128], index: 2, kind: input, shape index: {}]   ;;  %s1524_s3 = inlined_call_operand.hbm [shape: bf16[128,128], index: 3, kind: input, shape index: {}]   ;;  %s1525_s4 = inlined_call_operand.vmem [shape: f32[1,128], index: 4, kind: input, shape index: {}]   ;;  %s1526_s5 = inlined_call_operand.vmem [shape: bf16[128,128], index: 5, kind: input, shape index: {}]   ;;  %s1527_s6 = inlined_call_operand.vmem [shape: f32[1,128], index: 6, kind: input, shape index: {}]   ;;  %s1528_s7 = inlined_call_operand.hbm [shape: f32[16,128], index: 7, kind: output, shape index: {}]  }
   0x1   :  { %13 = vsyncpa [#allocation6], 0 }
   0x2   :  { %14 = vsyncpa [#allocation4], 0 }
   0x3   :  { %16 = vsyncpa [#allocation4 + $0x1], 0  ;;  %s1275_s24 = smov 0   ;;  %s1277_s25 = smov 0  }
   0x4   :  { %s1279_s26 = smov 0   ;;  %s1281_s27 = smov 0  }
   0x5 LB: > { %s1296_s28 = sadd.s32 4294967295, %s1218_s27   ;;  %s852_s29 = sadd.s32 4294967294, %s1218_s27   ;;  %s1218_s27 = sphi %s1281_s27, %s1548_s27   ;;  %s1214_s26 = sphi %s1279_s26, %s1547_s26   ;;  %s1210_s25 = sphi %s1277_s25, %s1546_s25   ;;  %s1206_s24 = sphi %s1275_s24, %s1545_s24  }
   0x6   : > { %s1300_s30 = sadd.s32 1, %s1218_s27   ;;  %s186_s8 = sadd.s32 1, %s1214_s26 }
   0x7   : > { %s183_s9 = ssub.s32 %s1218_s27, %s1300_s30  ;;  %p196_p0 = scmp.ne.s32.totalorder %s1214_s26, %s1210_s25 }
   0x8   : > { %p184_p1 = scmp.eq.s32.totalorder %s183_s9, 0  ;;  %p197_p2 = scmp.eq.s32.totalorder %s1296_s28, 1 }
   0x9   : > { %p202_p3 = scmp.ne.s32.totalorder %s1210_s25, %s1206_s24  ;;  %p203_p4 = scmp.eq.s32.totalorder %s852_s29, 1 }
   0xa   : > { %s1311_s10 = scalar_select %p184_p1, %s1214_s26, %s186_s8  }
   0xb   : > { %p1313_p5 = por %p197_p2, %p196_p0  ;;  %p1317_p6 = por %p203_p4, %p202_p3 }
   0xc   : > { %1532 = sst [smem:[#allocation11_spill]] %s1311_s10  ;;  %p853_p7 = scmp.ge.s32.totalorder %s1218_s27, 1 }
   0xd   : > { %s1533_s11 = scalar_select %p1313_p5, 1, 0 }
   0xe   : > { %s1534_s12 = scalar_select %p1317_p6, 1, 0 }
   0xf   : > { %p210_p8 = scmp.lt.s32.totalorder %s1218_s27, 3  ;;  %p1529_p9 = scmp.eq.s32.totalorder %s1296_s28, 0 }
  0x10   : > { %s1220_s14 = smov [#allocation2]   ;;  %s1221_s17 = smov [#allocation5]  }
  0x11   : > { %p1324_p10 = pnand %p853_p7, %p210_p8  ;;  %s222_s15 = sshll.u32 %s1220_s14, 4  ;;  %s223_s15 = int_to_ptr.vmem [resolvable:$true] %s222_s15 }
  0x12   : > { %s235_s18 = sshll.u32 %s1221_s17, 4  ;;  %s1092_s21 = scalar_lea.hbm %s1523_s2, 1024  ;;  %s1336_s18 = int_to_ptr.vmem [resolvable:$true] %s235_s18 }
  0x13   : > { %s1535_s13 = scalar_select %p1324_p10, 1, 0 }
  0x14   : > { %p990_p11 = pneg %p1324_p10  ;;  %p1093_p13 = scmp.ne.s32.totalorder %s1523_s2, %s1092_s21 }
  0x15   : > { %p1099_p3 = scmp.lt.u32.totalorder %s1092_s21, %s1523_s2 }
  0x16   : > { %p1332_p12 = pnand %p1529_p9, %p990_p11 }
  0x18   : > { %p1094_p0 = pneg %p1332_p12 }
  0x1a   : > { %p1095_p1 = pnand %p1094_p0, %p1093_p13 }
  0x1c   : > { %p1096_p2 = pneg %p1095_p1 }
  0x1e   : > { %p1101_p4 = pnand %p1099_p3, %p1096_p2 }
  0x20   : > { %1104 = shalt.err (!%p1101_p4)
}
  0x21   : > { %s1105_s9 = scalar_lea.vmem %s223_s15, 1024  ;;  %p1113_p9 = scmp.lt.s32.totalorder %s223_s15, %s223_s15 }
  0x22   : > { %p1106_p7 = scmp.ne.s32.totalorder %s223_s15, %s1105_s9  ;;  %p1114_p6 = scmp.lt.s32.totalorder %s1105_s9, %s1105_s9 }
  0x24   : > { %p1108_p8 = pnand %p1106_p7, %p1094_p0  ;;  %p1115_p5 = por %p1114_p6, %p1113_p9 }
  0x26   : > { %p1109_p11 = pneg %p1108_p8 }
  0x28   : > { %p1116_p10 = pnand %p1115_p5, %p1109_p11 }
  0x2a   : > { %1119 = shalt.err (!%p1116_p10)
}
  0x2b   : > { %s1222_s14 = smov 64   ;;  %s1223_s17 = smov 4  }
  0x2c   : > { %993 = dma.hbm_to_vmem [thread:$0]  (!%p1332_p12), %s1523_s2, 1024, %s223_s15, [#allocation3], %s1222_s14, %s1222_s14, %s1223_s17  }
  0x2d   : > { %s1120_s23 = scalar_lea.hbm %s1524_s3, 1024 }
  0x2e   : > { %p1121_p13 = scmp.ne.s32.totalorder %s1524_s3, %s1120_s23  ;;  %p1127_p9 = scmp.lt.u32.totalorder %s1120_s23, %s1524_s3 }
  0x30   : > { %p1123_p5 = pnand %p1121_p13, %p1094_p0 }
  0x32   : > { %p1124_p6 = pneg %p1123_p5 }
  0x34   : > { %p1129_p10 = pnand %p1127_p9, %p1124_p6 }
  0x36   : > { %1132 = shalt.err (!%p1129_p10)
}
  0x37   : > { %s1133_s15 = scalar_lea.vmem %s1336_s18, 1024  ;;  %p1141_p4 = scmp.lt.s32.totalorder %s1336_s18, %s1336_s18 }
  0x38   : > { %p1134_p1 = scmp.ne.s32.totalorder %s1336_s18, %s1133_s15  ;;  %p1142_p7 = scmp.lt.s32.totalorder %s1133_s15, %s1133_s15 }
  0x3a   : > { %p1136_p2 = pnand %p1134_p1, %p1094_p0  ;;  %p1143_p8 = por %p1142_p7, %p1141_p4 }
  0x3c   : > { %p1137_p3 = pneg %p1136_p2 }
  0x3e   : > { %p1144_p11 = pnand %p1143_p8, %p1137_p3 }
  0x40   : > { %1147 = shalt.err (!%p1144_p11)
}
  0x41   : > { %996 = dma.hbm_to_vmem [thread:$0]  (!%p1332_p12), %s1524_s3, 1024, %s1336_s18, [#allocation6], %s1222_s14, %s1222_s14, %s1223_s17  }
  0x42   : > { %p1537_p13 = scmp.ne.s32.totalorder %s1535_s13, 0 }
  0x43   : > { %p1538_p5 = scmp.eq.s32.totalorder (!%p1537_p13), %s1296_s28, 0 }
  0x44   : > { %274 = sbr.rel (%p1537_p13) target bundleno = 925 (0x39d), region = 48 }
  0x4b   : > { %1193 = dma.done.wait (%p1538_p5), [#allocation3], 1024   ;;  %p1539_p0 = pmov %p1538_p5 }
  0x4d   : > { %1195 = vsyncadd (%p1539_p0), [#allocation3], 4294966272  ;;  %p1540_p6 = pmov %p1539_p0 }
  0x4e   : > { %p1541_p9 = pmov %p1539_p0 }
  0x4f   : > { %1197 = dma.done.wait (%p1540_p6), [#allocation6], 1024  }
  0x50   : > { %1199 = vsyncadd (%p1541_p9), [#allocation6], 4294966272  ;;  %p313_p10 = scmp.lt.s32.totalorder %s1296_s28, 1  ;;  %v1224_v0 = vmov 0   ;;  %v1225_v3 = vmov 1   ;;  %v1226_v4 = vmov 2   ;;  %v324_v33 = vlaneseq }
  0x51   : > { %1054 = vset.pattern.permute.xlu1 %v1224_v0  ;;  %1052 = vset.pattern.permute.xlu0 %v1224_v0  ;;  %v1227_v5 = vmov 3   ;;  %v1228_v6 = vmov 4   ;;  %v1066_v7 = vld [vmem:[#allocation2] sm:$0xff]   ;;  %v1229_v8 = vmov 0.0   ;;  %v1230_v9 = vmov 5   ;;  %v1067_v10 = vld [vmem:[#allocation2 + $0x8] sm:$0xff]  }
  0x52   : > { %s314_s13 = scalar_select %p313_p10, %s1296_s28, 1  ;;  %920 = vmatprep.subr.bf16.mxu0 %v1229_v8  ;;  %940 = vmatprep.subr.bf16.mxu1 %v1229_v8  ;;  %v1068_v11 = vld [vmem:[#allocation2 + $0x10] sm:$0xff]   ;;  %v1231_v12 = vmov 7   ;;  %v1069_v13 = vld [vmem:[#allocation2 + $0x18] sm:$0xff]   ;;  %v1070_v14 = vld [vmem:[#allocation2 + $0x20] sm:$0xff]   ;;  %v1232_v15 = vmov 6  }
  0x53   : > { %921 = vmatpush3.bf16.msra.mxu0 %v1066_v7  ;;  %v1071_v16 = vld [vmem:[#allocation2 + $0x28] sm:$0xff]   ;;  %v1072_v17 = vld [vmem:[#allocation2 + $0x30] sm:$0xff]   ;;  %v1073_v18 = vld [vmem:[#allocation2 + $0x38] sm:$0xff]   ;;  %vm1233_vm0 = vmmov 0   ;;  %vm512_vm1 = vcmask 64512   ;;  %v325_v36 = vand.u32 127, %v324_v33 }
  0x54   : > { %s861_s16 = sshll.u32 %s314_s13, 3  ;;  %922 = vmatprep.subr.bf16.mxu0 %v1229_v8  ;;  %936 = vmatprep.mubr.msk.bf16.mxu0 %vm1233_vm0, %v1229_v8  ;;  %v1074_v19 = vld [vmem:[#allocation5] sm:$0xff]   ;;  %v1075_v20 = vld [vmem:[#allocation5 + $0x8] sm:$0xff]   ;;  %v1076_v21 = vld [vmem:[#allocation5 + $0x10] sm:$0xff]   ;;  %s310_s9 = sand.u32 1, %s1210_s25  }
  0x55   : > { %s320_s17 = scalar_lea.vmem %s1522_s1, %s861_s16  ;;  %s316_s22 = scalar_lea.vmem %s1521_s0, %s861_s16  ;;  %956 = vmatprep.mubr.msk.bf16.mxu1 %vm1233_vm0, %v1229_v8  ;;  %941 = vmatpush3.bf16.msra.mxu1 %v1074_v19  ;;  %v1077_v22 = vld [vmem:[#allocation5 + $0x18] sm:$0xff]   ;;  %v1078_v24 = vld [vmem:[#allocation5 + $0x20] sm:$0xff]   ;;  %v1079_v25 = vld [vmem:[#allocation5 + $0x28] sm:$0xff]  }
  0x56   : > { %v1403_v1 = vld [vmem:[%s320_s17] sm:$0xff]  ;;  %942 = vmatprep.subr.bf16.mxu1 %v1229_v8  ;;  %v1081_v61 = vld [vmem:[#allocation5 + $0x38] sm:$0xff]   ;;  %v1084_v0 = vld [vmem:[%s1526_s5 + $0x10] sm:$0xff]   ;;  %s860_s15 = sshll.u32 %s310_s9, 3  ;;  %s890_s13 = sshll.u32 %s1296_s28, 7 }
  0x57   : > { %v322_v2 = vld [vmem:[%s316_s22] sm:$0xff]  ;;  %332 = vperm.xlu1 %1054, %v1403_v1   ;;  %923 = vmatpush3.bf16.msra.mxu0 %v1067_v10  ;;  %v513_v23 = vsel %vm512_vm1, %v1403_v1, 0.0  ;;  %v1083_v63 = vld [vmem:[%s1526_s5 + $0x8] sm:$0xff]   ;;  %s312_s16 = scalar_lea.vmem [#allocation7], %s860_s15  ;;  %s1479_s20 = scalar_lea.hbm %s1528_s7, %s890_s13 }
  0x58   : > { %327 = vperm.xlu0 %1052, %v322_v2   ;;  %924 = vmatprep.subr.bf16.mxu0 %v1229_v8  ;;  %v1080_v26 = vld [vmem:[#allocation5 + $0x30] sm:$0xff]   ;;  %s759_s18 = sshll.u32 %s312_s16, 4  ;;  %s746_s21 = scalar_lea.sflag [#allocation4], %s310_s9  ;;  %s1481_s18 = int_to_ptr.vmem [resolvable:$true] %s759_s18 }
  0x59   : > { %943 = vmatpush3.bf16.msra.mxu1 %v1075_v20  ;;  %v1082_v62 = vld [vmem:[%s1526_s5] sm:$0xff]   ;;  %s1148_s28 = scalar_lea.vmem %s1481_s18, 128  ;;  %p1542_p1 = scmp.ne.s32.totalorder %s1533_s11, 0 }
  0x5a   : > { %944 = vmatprep.subr.bf16.mxu1 %v1229_v8  ;;  %p1149_p12 = scmp.ne.s32.totalorder %s1481_s18, %s1148_s28  ;;  %s1234_s22 = smov [#allocation7]  }
  0x5b   : > { %1055 = vset.pattern.permute.xlu1 %v1225_v3  ;;  %925 = vmatpush3.bf16.msra.mxu0 %v1068_v11  ;;  %s1152_s23 = sshll.u32 %s1234_s22, 4  ;;  %s1153_s23 = int_to_ptr.vmem [resolvable:$false] %s1152_s23 }
  0x5c   : > { %1053 = vset.pattern.permute.xlu0 %v1225_v3  ;;  %342 = vperm.xlu1 %1055, %v1403_v1   ;;  %v1087_v3 = vld [vmem:[%s1526_s5 + $0x28] sm:$0xff]   ;;  %p1150_p2 = pnand %p1149_p12, %p1542_p1  ;;  %s1154_s29 = scalar_lea.vmem %s1153_s23, 256 }
  0x5d   : > { %338 = vperm.xlu0 %1053, %v322_v2   ;;  %926 = vmatprep.subr.bf16.mxu0 %v1229_v8  ;;  %p1155_p4 = scmp.lt.s32.totalorder %s1481_s18, %s1153_s23  ;;  %p1156_p7 = scmp.lt.s32.totalorder %s1154_s29, %s1148_s28 }
  0x5e   : > { %945 = vmatpush3.bf16.msra.mxu1 %v1076_v21  ;;  %p1151_p3 = pneg %p1150_p2 }
  0x5f   : > { %927 = vmatpush3.bf16.msra.mxu0 %v1069_v13  ;;  %946 = vmatprep.subr.bf16.mxu1 %v1229_v8  ;;  %p1157_p8 = por %p1156_p7, %p1155_p4 }
  0x60   : > { %1056 = vset.pattern.permute.xlu1 %v1226_v4  ;;  %928 = vmatprep.subr.bf16.mxu0 %v1229_v8 }
  0x61   : > { %1057 = vset.pattern.permute.xlu0 %v1226_v4  ;;  %348 = vperm.xlu1 %1056, %v322_v2   ;;  %p1158_p11 = pnand %p1157_p8, %p1151_p3 }
  0x62   : > { %352 = vperm.xlu0 %1057, %v1403_v1   ;;  %947 = vmatpush3.bf16.msra.mxu1 %v1077_v22 }
  0x63   : > { %929 = vmatpush3.bf16.msra.mxu0 %v1070_v14  ;;  %948 = vmatprep.subr.bf16.mxu1 %v1229_v8  ;;  %v1088_v14 = vld [vmem:[%s1526_s5 + $0x30] sm:$0xff]  }
  0x64   : > { %930 = vmatprep.subr.bf16.mxu0 %v1229_v8 }
  0x65   : > { %1058 = vset.pattern.permute.xlu1 %v1227_v5 }
  0x66   : > { %1059 = vset.pattern.permute.xlu0 %v1228_v6  ;;  %358 = vperm.xlu1 %1058, %v322_v2  }
  0x67   : > { %368 = vperm.xlu0 %1059, %v322_v2   ;;  %931 = vmatpush3.bf16.msra.mxu0 %v1071_v16  ;;  %v871_v16 = vld [vmem:[%s1525_s4] ss:$0 sm:$0xff] }
  0x68   : > { %932 = vmatprep.subr.bf16.mxu0 %v1229_v8  ;;  %949 = vmatpush3.bf16.msra.mxu1 %v1078_v24 }
  0x69   : > { %950 = vmatprep.subr.bf16.mxu1 %v1229_v8 }
  0x6a   : > { %362 = vperm.xlu1 %1058, %v1403_v1  }
  0x6b   : > { %1062 = vset.pattern.permute.xlu0 %v1230_v9  ;;  %933 = vmatpush3.bf16.msra.mxu0 %v1072_v17 }
  0x6c   : > { %382 = vperm.xlu0 %1062, %v1403_v1   ;;  %934 = vmatprep.subr.bf16.mxu0 %v1229_v8 }
  0x6d   : > { %951 = vmatpush3.bf16.msra.mxu1 %v1079_v25 }
  0x6e   : > { %1060 = vset.pattern.permute.xlu1 %v1228_v6  ;;  %952 = vmatprep.subr.bf16.mxu1 %v1229_v8 }
  0x6f   : > { %372 = vperm.xlu1 %1060, %v1403_v1   ;;  %935 = vmatpush3.bf16.msra.mxu0 %v1073_v18 }
  0x70   : > { %1064 = vset.pattern.permute.xlu0 %v1231_v12  ;;  %960 = vmatprep.subr.bf16.mxu0 %v1229_v8 }
  0x71   : > { %398 = vperm.xlu0 %1064, %v322_v2   ;;  %953 = vmatpush3.bf16.msra.mxu1 %v1080_v26 }
  0x72   : > { %954 = vmatprep.subr.bf16.mxu1 %v1229_v8 }
  0x73   : > { %1061 = vset.pattern.permute.xlu1 %v1230_v9 }
  0x74   : > { %378 = vperm.xlu1 %1061, %v322_v2  }
  0x75   : > { %955 = vmatpush3.bf16.msra.mxu1 %v1081_v61 }
  0x78   : > { %1063 = vset.pattern.permute.xlu1 %v1232_v15  ;;  %v1089_v15 = vld [vmem:[%s1526_s5 + $0x38] sm:$0xff]  }
  0x79   : > { %388 = vperm.xlu1 %1063, %v322_v2   ;;  %v1086_v2 = vld [vmem:[%s1526_s5 + $0x20] sm:$0xff]  }
  0x7d   : > { %392 = vperm.xlu1 %1063, %v1403_v1  }
  0x81   : > { %1065 = vset.pattern.permute.xlu1 %v1231_v12 }
  0x82   : > { %402 = vperm.xlu1 %1065, %v1403_v1   ;;  %v1085_v1 = vld [vmem:[%s1526_s5 + $0x18] sm:$0xff]  }
  0xa6   : > { %514 = vadd.xlane.f32.xlu1 %v513_v23 }
  0xd6   : > { %v333_v27 = vpop.permute.xlu1 %332 }
  0xd7   : > { %v328_v31 = vpop.permute.xlu0 %327 }
  0xd8   : > { %vm329_vm3 = vcmp.eq.s32.totalorder %v328_v31, %v325_v36 }
  0xd9   : > { %v335_v41 = vsel %vm329_vm3, %v333_v27, 0.0 }
  0xdb   : > { %v343_v28 = vpop.permute.xlu1 %342 }
  0xdc   : > { %v339_v34 = vpop.permute.xlu0 %338 }
  0xdd   : > { %vm340_vm2 = vcmp.eq.s32.totalorder %v339_v34, %v325_v36 }
  0xde   : > { %v345_v39 = vsel %vm340_vm2, %v343_v28, 0.0 }
  0xdf   : > { %v346_v43 = vadd.f32 %v345_v39, %v335_v41 }
  0xe0   : > { %v349_v29 = vpop.permute.xlu1 %348 }
  0xe1   : > { %v353_v37 = vpop.permute.xlu0 %352  ;;  %vm350_vm4 = vcmp.eq.s32.totalorder %v349_v29, %v325_v36 }
  0xe2   : > { %v355_v42 = vsel %vm350_vm4, %v353_v37, 0.0 }
  0xe3   : > { %v356_v47 = vadd.f32 %v355_v42, %v346_v43 }
  0xe5   : > { %v359_v30 = vpop.permute.xlu1 %358 }
  0xe6   : > { %v369_v40 = vpop.permute.xlu0 %368  ;;  %vm360_vm5 = vcmp.eq.s32.totalorder %v359_v30, %v325_v36 }
  0xe7   : > { %vm370_vm6 = vcmp.eq.s32.totalorder %v369_v40, %v325_v36 }
  0xe9   : > { %v363_v32 = vpop.permute.xlu1 %362 }
  0xea   : > { %v365_v44 = vsel %vm360_vm5, %v363_v32, 0.0 }
  0xeb   : > { %v383_v45 = vpop.permute.xlu0 %382  ;;  %v366_v49 = vadd.f32 %v365_v44, %v356_v47 }
  0xee   : > { %v373_v35 = vpop.permute.xlu1 %372 }
  0xef   : > { %v375_v48 = vsel %vm370_vm6, %v373_v35, 0.0 }
  0xf0   : > { %v399_v52 = vpop.permute.xlu0 %398  ;;  %v376_v53 = vadd.f32 %v375_v48, %v366_v49 }
  0xf1   : > { %vm400_vm9 = vcmp.eq.s32.totalorder %v399_v52, %v325_v36 }
  0xf3   : > { %v379_v38 = vpop.permute.xlu1 %378 }
  0xf4   : > { %vm380_vm7 = vcmp.eq.s32.totalorder %v379_v38, %v325_v36 }
  0xf5   : > { %v385_v50 = vsel %vm380_vm7, %v383_v45, 0.0 }
  0xf6   : > { %v386_v55 = vadd.f32 %v385_v50, %v376_v53 }
  0xf8   : > { %v389_v46 = vpop.permute.xlu1 %388 }
  0xf9   : > { %vm390_vm8 = vcmp.eq.s32.totalorder %v389_v46, %v325_v36 }
  0xfc   : > { %v393_v51 = vpop.permute.xlu1 %392 }
  0xfd   : > { %v395_v54 = vsel %vm390_vm8, %v393_v51, 0.0 }
  0xfe   : > { %v396_v56 = vadd.f32 %v395_v54, %v386_v55 }
 0x101   : > { %v403_v57 = vpop.permute.xlu1 %402 }
 0x102   : > { %v405_v58 = vsel %vm400_vm9, %v403_v57, 0.0 }
 0x103   : > { %v406_v59 = vadd.f32 %v405_v58, %v396_v56 }
 0x105   : > { %v407_v60 = vpack.c.bf16 %v406_v59, %v406_v59 }
 0x107   : > { %937 = vmatmul.mubr.bf16.vlgmr.msra.gmra.mrb[0].mxu0 %v407_v60 }
 0x108   : > { %976 = vmatprep.mubr.msk.bf16.mxu0 %vm1233_vm0, %v1229_v8  ;;  %961 = vmatpush3.bf16.msra.mxu0 %v1082_v62 }
 0x109   : > { %962 = vmatprep.subr.bf16.mxu0 %v1229_v8 }
 0x10c   : > { %963 = vmatpush3.bf16.msra.mxu0 %v1083_v63 }
 0x10d   : > { %964 = vmatprep.subr.bf16.mxu0 %v1229_v8 }
 0x110   : > { %965 = vmatpush3.bf16.msra.mxu0 %v1084_v0 }
 0x111   : > { %966 = vmatprep.subr.bf16.mxu0 %v1229_v8 }
 0x114   : > { %967 = vmatpush3.bf16.msra.mxu0 %v1085_v1 }
 0x115   : > { %968 = vmatprep.subr.bf16.mxu0 %v1229_v8 }
 0x118   : > { %969 = vmatpush3.bf16.msra.mxu0 %v1086_v2 }
 0x119   : > { %970 = vmatprep.subr.bf16.mxu0 %v1229_v8 }
 0x11c   : > { %971 = vmatpush3.bf16.msra.mxu0 %v1087_v3 }
 0x11d   : > { %972 = vmatprep.subr.bf16.mxu0 %v1229_v8 }
 0x120   : > { %973 = vmatpush3.bf16.msra.mxu0 %v1088_v14 }
 0x121   : > { %974 = vmatprep.subr.bf16.mxu0 %v1229_v8  ;;  %v880_v8 = vld [vmem:[%s1527_s6] ss:$0 sm:$0xff] }
 0x124   : > { %975 = vmatpush3.bf16.msra.mxu0 %v1089_v15 }
 0x133   : > { %v515_v4 = vpop.xlane.xlu1 %514 }
 0x134   : > { %v516_v5 = vmax.f32 %v515_v4, 1e-09 }
 0x136   : > { %1090 = vrcp.f32 %v516_v5 }
 0x140   : > { %v1091_v6 = vpop.eup %1090 }
 0x1da   : > { %v506_v7 = vpop.f32.mrb[0].mxu0 }
 0x1db   : > { %v518_v9 = vmul.f32 %v1091_v6, %v506_v7  ;;  %v938_v10 = vpop.f32.mrb[1].mxu0 }
 0x1dc   : > { %v509_v11 = vpop.f32.mrb[2].mxu0 }
 0x1dd   : > { %v519_v12 = vpack.c.bf16 %v518_v9, %v518_v9  ;;  %v939_v13 = vpop.f32.mrb[3].mxu0 }
 0x1df   : > { %957 = vmatmul.mubr.bf16.vlgmr.msra.gmra.mrb[0].mxu1 %v519_v12 }
 0x2b2   : > { %v625_v17 = vpop.f32.mrb[0].mxu1 }
 0x2b3   : > { %v626_v18 = vadd.f32 %v871_v16, %v625_v17  ;;  %v958_v19 = vpop.f32.mrb[1].mxu1 }
 0x2b4   : > { %v628_v20 = vpop.f32.mrb[2].mxu1 }
 0x2b5   : > { %v631_v21 = vmax.f32 %v626_v18, 0.0  ;;  %v959_v22 = vpop.f32.mrb[3].mxu1 }
 0x2b7   : > { %v632_v23 = vpack.c.bf16 %v631_v21, %v631_v21 }
 0x2b9   : > { %977 = vmatmul.mubr.bf16.vlgmr.msra.gmra.mrb[4].mxu0 %v632_v23 }
 0x38c   : > { %v738_v24 = vpop.f32.mrb[4].mxu0 }
 0x38d   : > { %v739_v25 = vadd.f32 %v880_v8, %v738_v24  ;;  %v978_v26 = vpop.f32.mrb[5].mxu0 }
 0x38e   : > { %v741_v27 = vpop.f32.mrb[6].mxu0 }
 0x38f   : > { %744 = vst [vmem:[%s312_s16] sm:$0xff] %v739_v25  ;;  %v979_v28 = vpop.f32.mrb[7].mxu0 }
 0x390   : > { %1161 = shalt.err (!%p1158_p11)
}
 0x391   : > { %s1162_s8 = scalar_lea.hbm %s1479_s20, 128  ;;  %s1166_s10 = scalar_lea.hbm %s1528_s7, 256 }
 0x392   : > { %p1163_p13 = scmp.ne.s32.totalorder %s1479_s20, %s1162_s8  ;;  %p1167_p6 = scmp.lt.u32.totalorder %s1479_s20, %s1528_s7 }
 0x393   : > { %p1168_p9 = scmp.lt.u32.totalorder %s1166_s10, %s1162_s8  ;;  %p1170_p12 = scmp.lt.u32.totalorder %s1162_s8, %s1479_s20 }
 0x394   : > { %p1164_p5 = pnand %p1163_p13, %p1542_p1 }
 0x395   : > { %p1169_p10 = por %p1168_p9, %p1167_p6 }
 0x396   : > { %p1165_p0 = pneg %p1164_p5 }
 0x397   : > { %p1171_p2 = por %p1170_p12, %p1169_p10 }
 0x399   : > { %p1172_p3 = pnand %p1171_p2, %p1165_p0 }
 0x39b   : > { %1175 = shalt.err (!%p1172_p3)
}
 0x39c   : > { %988 = dma.vmem_to_hbm [thread:$0]  (%p1542_p1), %s1481_s18, 128, %s1479_s20, %s746_s21  }
 0x39d PF: > { %p1005_p4 = scmp.ge.s32.totalorder %s1218_s27, 2  ;;  %s771_s16 = sand.u32 1, %s1206_s24  }
 0x39e   : > { %p1543_p7 = scmp.ne.s32.totalorder %s1534_s12, 0  ;;  %s772_s14 = scalar_lea.sflag [#allocation4], %s771_s16 }
 0x3a0   : > { %p998_p8 = pnand %p1005_p4, %p1543_p7 }
 0x3a2   : > { %1201 = dma.done.wait (!%p998_p8), %s772_s14, 128  }
 0x3a3   : > { %1203 = vsyncadd (!%p998_p8), %s772_s14, 4294967168  ;;  %s1544_s17 = sld [smem:[#allocation11_spill]]  ;;  %p19_p11 = scmp.ge.s32.totalorder %s1300_s30, 4  }
 0x3a4   : > { %s1545_s24 = smov %s1210_s25  ;;  %s1546_s25 = smov %s1214_s26 }
 0x3a5   : > { %s1548_s27 = smov %s1300_s30  ;;  %21 = sbr.rel (!%p19_p11) target bundleno = 5 (0x5), region = 95 }
 0x3a9   : > { %s1547_s26 = smov %s1544_s17 }
 0x3ac   :  { %777 = vsyncpa [#allocation3], 1 }
 0x3ad   :  { %779 = vsyncpa [#allocation3 + $0x1], 1 }
 0x3ae   :  { %780 = vsyncpa [#allocation6], 1 }
 0x3af   :  { %781 = vsyncpa [#allocation4], 1 }
 0x3b0   :  { %783 = vsyncpa [#allocation4 + $0x1], 1 }

</bundles_post_ra>
